<compile_context>
chip_gen: v6e
topology: v6e:2x2x1
jax: 0.10.0
libtpu: 0.0.40
codegen_flags: <defaults>
</compile_context>

<pallas_src>
import functools

import jax
import jax.numpy as jnp
import numpy as np
from jax.experimental import pallas as pl
from jax.experimental.pallas import tpu as pltpu


# ---------------------------------------------------------------------------
# Pallas kernel: one grid step == (batch element, query tile).
# ---------------------------------------------------------------------------
def _expanded_attn_kernel(
    x_ref,      # (1, S, D)      hidden states (full sequence; q tile sliced out)
    wq_ref,     # (Ht*d_kv, D)   merged Q weights (nn.Linear layout, scale folded)
    wk_ref,     # (Ht*d_kv, D)   merged K weights
    wv_ref,     # (Ht*d_kv, D)   merged V weights
    wo_ref,     # (Ht*d_kv, D)   merged O weights (gate folded into new-head rows)
    out_ref,    # (1, TQ, D)
    kt_sc,      # (Ht, d_kv, S)  scratch: K^T, lane-dense in S
    v_sc,       # (Ht, S, d_kv)  scratch: V
    *, n_heads_total, d_kv, q_tile, kv_chunk, num_q_tiles, approx_recip):
  qi = pl.program_id(1)
  Ht = n_heads_total
  cdt = x_ref.dtype               # compute dtype (bf16 perf mode / f32 check mode)
  S = x_ref.shape[1]

  # ---- K / V projections: once per batch element (first query tile) --------
  # Packed, lane-dense 2-D matmuls (N = S), cached head-major in VMEM scratch
  # and reused by every q tile.  All head split relayouts happen on the f32
  # matmul results and only touch whole sublane tiles (d_kv % 8 == 0).
  @pl.when(qi == 0)
  def _():
    x_t = x_ref[0].T                                                  # (D, S)
    kt = jnp.dot(wk_ref[...], x_t,
                 preferred_element_type=jnp.float32)                  # (Ht*d_kv, S)
    kt_sc[...] = kt.reshape(Ht, d_kv, S).astype(kt_sc.dtype)          # (Ht, d_kv, S)
    vt = jnp.dot(wv_ref[...], x_t,
                 preferred_element_type=jnp.float32)                  # (Ht*d_kv, S)
    v_sc[...] = jnp.swapaxes(vt.reshape(Ht, d_kv, S), 1, 2).astype(v_sc.dtype)

  # ---- Q projection for this query tile (packed matmul, N = TQ) ------------
  if num_q_tiles == 1:
    xq = x_ref[0]                                                     # (TQ=S, D)
  else:
    q_start = pl.multiple_of(qi * q_tile, q_tile)
    xq = x_ref[0, pl.ds(q_start, q_tile), :]                          # (TQ, D)
  qt = jnp.dot(wq_ref[...], xq.T,
               preferred_element_type=jnp.float32)                    # (Ht*d_kv, TQ)
  q = jnp.swapaxes(qt.reshape(Ht, d_kv, q_tile), 1, 2).astype(cdt)    # (Ht, TQ, d_kv)

  # ---- KV-chunked online softmax (flash-style running max/denom/context) ---
  num_chunks = S // kv_chunk
  m = jnp.full((Ht, q_tile, 1), -jnp.inf, jnp.float32)
  l = jnp.zeros((Ht, q_tile, 1), jnp.float32)
  acc = jnp.zeros((Ht, q_tile, d_kv), jnp.float32)
  # num_chunks is a trace-time constant -> static unroll.
  # TODO(synk): for very long sequences switch to lax.fori_loop to bound live
  #             ranges (a static Python loop does not).
  for c in range(num_chunks):
    kt_c = kt_sc[:, :, pl.ds(c * kv_chunk, kv_chunk)]                 # (Ht, d_kv, TS)
    v_c = v_sc[:, pl.ds(c * kv_chunk, kv_chunk), :]                   # (Ht, TS, d_kv)
    s = jnp.einsum('hqd,hdk->hqk', q, kt_c,
                   preferred_element_type=jnp.float32)                # (Ht, TQ, TS)
    m_new = jnp.maximum(m, jnp.max(s, axis=-1, keepdims=True))
    alpha = jnp.exp(m - m_new)
    p = jnp.exp(s - m_new)
    l = alpha * l + jnp.sum(p, axis=-1, keepdims=True)
    acc = alpha * acc + jnp.einsum('hqk,hkd->hqd', p.astype(cdt), v_c,
                                   preferred_element_type=jnp.float32)
    m = m_new

  ctx = acc * pl.reciprocal(l, approx=approx_recip)                   # (Ht, TQ, d_kv)

  # ---- Packed output projection: one matmul with K = Ht*d_kv, N = D --------
  # (tile-aligned head merge on f32, then a small 2-D transpose)
  ctx_p = jnp.swapaxes(ctx, 1, 2).reshape(Ht * d_kv, q_tile)          # (Ht*d_kv, TQ)
  out = jnp.dot(ctx_p.T.astype(cdt), wo_ref[...],
                preferred_element_type=jnp.float32)                   # (TQ, D)
  out_ref[0] = out.astype(out_ref.dtype)


# ---------------------------------------------------------------------------
# VMEM budget estimate (padded to (sublane, lane) tiles)
# ---------------------------------------------------------------------------
def _padded_bytes(shape, dtype):
  itemsize = jnp.dtype(dtype).itemsize
  pack = max(1, 4 // itemsize)
  lane = -(-shape[-1] // 128) * 128
  sub = -(-shape[-2] // (8 * pack)) * (8 * pack)
  lead = int(np.prod(shape[:-2])) if len(shape) > 2 else 1
  return lead * sub * lane * itemsize


# ---------------------------------------------------------------------------
# Wrapper
# ---------------------------------------------------------------------------
def fixed_expanded_mha(hidden_states, params, *, n_heads, d_kv, num_new_heads,
                       compute_dtype=jnp.bfloat16, q_tile=None, kv_chunk=None):
  B, S, D = hidden_states.shape
  Ht = n_heads + num_new_heads
  Htd = Ht * d_kv
  cdt = jnp.dtype(compute_dtype)
  f32 = jnp.float32

  if q_tile is None:
    # 128 keeps v7x (64 MiB VMEM) comfortable; fall back to full S otherwise.
    q_tile = 128 if S % 128 == 0 else S
  assert S % q_tile == 0, "sequence length must be divisible by the q tile"
  nq = S // q_tile
  if kv_chunk is None:
    kv_chunk = 512 if S % 512 == 0 else S
  assert S % kv_chunk == 0, "sequence length must be divisible by the kv chunk"

  # --- Merge the two head groups into one packed weight set (fold in f32,
  # --- then cast once to the compute dtype):
  #       * 1/sqrt(d_kv) (new-head score scale) -> new-head Q columns
  #       * sigmoid(gate)*0.25                  -> new-head O rows
  #     The original (T5-style) heads use no score scaling.
  gate_val = jax.nn.sigmoid(params["gate"].astype(f32).reshape(())) * 0.25
  inv_sqrt_dkv = 1.0 / float(np.sqrt(d_kv))
  wq = jnp.concatenate([params["wq_o"].astype(f32),
                        params["wq_n"].astype(f32) * inv_sqrt_dkv],
                       axis=1).T.astype(cdt)                     # (Htd, D)
  wk = jnp.concatenate([params["wk_o"].astype(f32),
                        params["wk_n"].astype(f32)], axis=1).T.astype(cdt)
  wv = jnp.concatenate([params["wv_o"].astype(f32),
                        params["wv_n"].astype(f32)], axis=1).T.astype(cdt)
  wo = jnp.concatenate([params["wo_o"].astype(f32),
                        params["wo_n"].astype(f32) * gate_val],
                       axis=0).astype(cdt)                       # (Htd, D)

  x_c = hidden_states.astype(cdt)

  # --- VMEM budget from padded-buffer math (double-buffered pipeline bufs,
  # --- single-buffered scratch, plus the per-step working set).
  est = 0
  est += 2 * _padded_bytes((1, S, D), cdt)                       # x block
  est += 2 * 4 * _padded_bytes((Htd, D), cdt)                    # 4 weights
  est += 2 * _padded_bytes((1, q_tile, D), hidden_states.dtype)  # out block
  est += _padded_bytes((Ht, d_kv, S), cdt)                       # K^T scratch
  est += _padded_bytes((Ht, S, d_kv), cdt)                       # V scratch
  est += 2 * _padded_bytes((Htd, S), f32)                        # proj intermediates
  est += 4 * _padded_bytes((Ht, q_tile, kv_chunk), f32)          # scores / exp
  est += 4 * _padded_bytes((Ht, q_tile, d_kv), f32)              # q / acc / ctx
  vmem_limit = int(min(max(est * 5 // 4, 32 * 1024 * 1024), 64 * 1024 * 1024))

  kernel = functools.partial(
      _expanded_attn_kernel,
      n_heads_total=Ht, d_kv=d_kv, q_tile=q_tile, kv_chunk=kv_chunk,
      num_q_tiles=nq, approx_recip=bool(cdt != jnp.dtype(jnp.float32)))

  def const_spec(shape):            # grid-invariant whole-array block
    return pl.BlockSpec(shape, lambda b, qi: (0,) * len(shape))

  return pl.pallas_call(
      kernel,
      out_shape=jax.ShapeDtypeStruct((B, S, D), hidden_states.dtype),
      grid=(B, nq),
      in_specs=[
          pl.BlockSpec((1, S, D), lambda b, qi: (b, 0, 0)),      # hidden states
          const_spec((Htd, D)),                                  # Wq (merged)
          const_spec((Htd, D)),                                  # Wk (merged)
          const_spec((Htd, D)),                                  # Wv (merged)
          const_spec((Htd, D)),                                  # Wo (merged)
      ],
      out_specs=pl.BlockSpec((1, q_tile, D), lambda b, qi: (b, qi, 0)),
      scratch_shapes=[
          pltpu.VMEM((Ht, d_kv, S), cdt),    # K^T (lane-dense in S)
          pltpu.VMEM((Ht, S, d_kv), cdt),    # V
      ],
      compiler_params=pltpu.CompilerParams(
          # qi must stay "arbitrary": the pl.when(qi==0) K/V scratch caching
          # relies on sequential iteration from 0 on each core.
          dimension_semantics=("parallel", "arbitrary"),
          vmem_limit_bytes=vmem_limit),
  )(x_c, wq, wk, wv, wo)


# ---------------------------------------------------------------------------
# Pure-JAX reference (mirrors the PyTorch forward, eval-mode dropout)
# ---------------------------------------------------------------------------
def reference(hidden_states, params, *, n_heads, d_kv, num_new_heads):
  B, S, D = hidden_states.shape
  with jax.default_matmul_precision("highest"):
    x = hidden_states.astype(jnp.float32)

    def mha(w_q, w_k, w_v, w_o, heads, scale):
      q = (x @ w_q).reshape(B, S, heads, d_kv).transpose(0, 2, 1, 3)
      k = (x @ w_k).reshape(B, S, heads, d_kv).transpose(0, 2, 1, 3)
      v = (x @ w_v).reshape(B, S, heads, d_kv).transpose(0, 2, 1, 3)
      scores = jnp.einsum("bhqd,bhkd->bhqk", q, k) * scale
      p = jax.nn.softmax(scores, axis=-1)
      o = jnp.einsum("bhqk,bhkd->bhqd", p, v)
      o = o.transpose(0, 2, 1, 3).reshape(B, S, heads * d_kv)
      return o @ w_o

    orig = mha(params["wq_o"], params["wk_o"], params["wv_o"], params["wo_o"],
               n_heads, 1.0)
    new = mha(params["wq_n"], params["wk_n"], params["wv_n"], params["wo_n"],
              num_new_heads, 1.0 / float(np.sqrt(d_kv)))
    gate_value = jax.nn.sigmoid(params["gate"].reshape(())) * 0.25
    return (orig + gate_value * new).astype(hidden_states.dtype)


# ---------------------------------------------------------------------------
# Deterministic parameter construction (matches module __init__ shapes)
# ---------------------------------------------------------------------------
def make_params(key, d_model, n_heads, d_kv, num_new_heads, dtype=jnp.float32):
  H_orig = n_heads * d_kv
  H_new = num_new_heads * d_kv
  ks = jax.random.split(key, 8)

  def xavier(k, fan_in, fan_out):
    bound = float(np.sqrt(6.0 / (fan_in + fan_out)))
    return jax.random.uniform(k, (fan_in, fan_out), dtype,
                              minval=-bound, maxval=bound)

  def normal(k, fan_in, fan_out):
    return (jax.random.normal(k, (fan_in, fan_out), dtype)
            * (1.0 / np.sqrt(fan_in))).astype(dtype)

  return {
      # frozen original (T5-style) attention projections (JAX layout: in, out)
      "wq_o": normal(ks[0], d_model, H_orig),
      "wk_o": normal(ks[1], d_model, H_orig),
      "wv_o": normal(ks[2], d_model, H_orig),
      "wo_o": normal(ks[3], H_orig, d_model),
      # new trainable heads (xavier_uniform, as in the module)
      "wq_n": xavier(ks[4], d_model, H_new),
      "wk_n": xavier(ks[5], d_model, H_new),
      "wv_n": xavier(ks[6], d_model, H_new),
      "wo_n": xavier(ks[7], H_new, d_model),
      # gate parameter initialized to -2.0
      "gate": jnp.full((1, 1), -2.0, dtype),
  }


if __name__ == "__main__":
  B, S = 2, 16
  d_model, n_heads, d_kv, num_new_heads = 32, 4, 8, 1

  key = jax.random.PRNGKey(0)
  kx, kp = jax.random.split(key)
  hidden_states = jax.random.normal(kx, (B, S, d_model), jnp.float32)
  params = make_params(kp, d_model, n_heads, d_kv, num_new_heads)

  ref = reference(hidden_states, params,
                  n_heads=n_heads, d_kv=d_kv, num_new_heads=num_new_heads)

  # 1) f32 compute path: exercises multi-q-tile (dynamic q slicing) and
  #    multi-chunk online-softmax code paths; exact reciprocal.
  out_f32 = fixed_expanded_mha(hidden_states, params,
                               n_heads=n_heads, d_kv=d_kv,
                               num_new_heads=num_new_heads,
                               compute_dtype=jnp.float32,
                               q_tile=8, kv_chunk=8)
  out_f32 = jax.block_until_ready(out_f32)
  np.testing.assert_allclose(np.asarray(out_f32), np.asarray(ref),
                             rtol=1e-3, atol=1e-3)

  # 2) bf16 performance mode: bf16 MXU operands, f32 accumulation, approx
  #    reciprocal (loose tolerance).
  out_bf16 = fixed_expanded_mha(hidden_states, params,
                                n_heads=n_heads, d_kv=d_kv,
                                num_new_heads=num_new_heads,
                                compute_dtype=jnp.bfloat16)
  out_bf16 = jax.block_until_ready(out_bf16)
  np.testing.assert_allclose(np.asarray(out_bf16), np.asarray(ref),
                             rtol=1e-1, atol=1e-1)

  print("KERNEL_OK")
</pallas_src>

<mosaic_0001>
module attributes {stable_mosaic.version = 11 : i64} {
  func.func @_expanded_attn_kernel(%arg0: i32, %arg1: i32, %arg2: memref<1x16x32xf32, #tpu.memory_space<vmem>>, %arg3: memref<40x32xf32, #tpu.memory_space<vmem>>, %arg4: memref<40x32xf32, #tpu.memory_space<vmem>>, %arg5: memref<40x32xf32, #tpu.memory_space<vmem>>, %arg6: memref<40x32xf32, #tpu.memory_space<vmem>>, %arg7: memref<1x8x32xf32, #tpu.memory_space<vmem>>, %arg8: memref<5x8x16xf32, #tpu.memory_space<vmem>>, %arg9: memref<5x16x8xf32, #tpu.memory_space<vmem>>) attributes {dimension_semantics = [#tpu.dimension_semantics<parallel>, #tpu.dimension_semantics<arbitrary>], iteration_bounds = array<i64: 2, 2>, scalar_prefetch = 0 : i64, scratch_operands = 2 : i64, tpu.core_type = #tpu.core_type<tc>, window_params = [{transform_indices = @transform_0, window_bounds = array<i64: 1, 16, 32>}, {pipeline_mode = #tpu.pipeline_mode<synchronous>, transform_indices = @transform_1, window_bounds = array<i64: 40, 32>}, {pipeline_mode = #tpu.pipeline_mode<synchronous>, transform_indices = @transform_2, window_bounds = array<i64: 40, 32>}, {pipeline_mode = #tpu.pipeline_mode<synchronous>, transform_indices = @transform_3, window_bounds = array<i64: 40, 32>}, {pipeline_mode = #tpu.pipeline_mode<synchronous>, transform_indices = @transform_4, window_bounds = array<i64: 40, 32>}, {transform_indices = @transform_5, window_bounds = array<i64: 1, 8, 32>}]} {
    %c0_i32 = arith.constant 0 : i32
    %0 = arith.cmpi eq, %arg1, %c0_i32 : i32
    %1 = arith.extui %0 : i1 to i32
    %c0_i32_0 = arith.constant 0 : i32
    %2 = arith.cmpi ne, %1, %c0_i32_0 : i32
    scf.if %2 {
      %c0_32 = arith.constant 0 : index
      %c0_33 = arith.constant 0 : index
      %c0_34 = arith.constant 0 : index
      %65 = vector.load %arg2[%c0_32, %c0_33, %c0_34] : memref<1x16x32xf32, #tpu.memory_space<vmem>>, vector<1x16x32xf32>
      %66 = vector.shape_cast %65 : vector<1x16x32xf32> to vector<16x32xf32>
      %67 = tpu.transpose %66, [1, 0] : vector<16x32xf32> -> vector<32x16xf32>
      %c0_35 = arith.constant 0 : index
      %c0_36 = arith.constant 0 : index
      %68 = vector.load %arg4[%c0_35, %c0_36] : memref<40x32xf32, #tpu.memory_space<vmem>>, vector<40x32xf32>
      %cst_37 = arith.constant dense<0.000000e+00> : vector<40x16xf32>
      %69 = tpu.matmul %68, %67, %cst_37 {dimension_numbers = #tpu.dot_dimension_numbers<[1], [0], [0], [1], [0, 0, 1, 1], [], []>} : vector<40x32xf32>, vector<32x16xf32>, vector<40x16xf32> -> vector<40x16xf32>
      %70 = vector.shape_cast %69 : vector<40x16xf32> to vector<5x8x16xf32>
      %c0_38 = arith.constant 0 : index
      %c0_39 = arith.constant 0 : index
      %c0_40 = arith.constant 0 : index
      %71 = vector.load %arg8[%c0_38, %c0_39, %c0_40] : memref<5x8x16xf32, #tpu.memory_space<vmem>>, vector<5x8x16xf32>
      tpu.vector_store %arg8[%c0_38, %c0_39, %c0_40], %70 {strides = array<i32>} : memref<5x8x16xf32, #tpu.memory_space<vmem>>, vector<5x8x16xf32>,
      %c0_41 = arith.constant 0 : index
      %c0_42 = arith.constant 0 : index
      %72 = vector.load %arg5[%c0_41, %c0_42] : memref<40x32xf32, #tpu.memory_space<vmem>>, vector<40x32xf32>
      %cst_43 = arith.constant dense<0.000000e+00> : vector<40x16xf32>
      %73 = tpu.matmul %72, %67, %cst_43 {dimension_numbers = #tpu.dot_dimension_numbers<[1], [0], [0], [1], [0, 0, 1, 1], [], []>} : vector<40x32xf32>, vector<32x16xf32>, vector<40x16xf32> -> vector<40x16xf32>
      %74 = vector.shape_cast %73 : vector<40x16xf32> to vector<5x8x16xf32>
      %75 = tpu.transpose %74, [0, 2, 1] : vector<5x8x16xf32> -> vector<5x16x8xf32>
      %c0_44 = arith.constant 0 : index
      %c0_45 = arith.constant 0 : index
      %c0_46 = arith.constant 0 : index
      %76 = vector.load %arg9[%c0_44, %c0_45, %c0_46] : memref<5x16x8xf32, #tpu.memory_space<vmem>>, vector<5x16x8xf32>
      tpu.vector_store %arg9[%c0_44, %c0_45, %c0_46], %75 {strides = array<i32>} : memref<5x16x8xf32, #tpu.memory_space<vmem>>, vector<5x16x8xf32>,
    } else {
    }
    %c8_i32 = arith.constant 8 : i32
    %3 = arith.muli %arg1, %c8_i32 : i32
    %4 = tpu.assume_multiple %3, 8 : i32
    %c0 = arith.constant 0 : index
    %5 = arith.index_cast %4 : i32 to index
    %c0_1 = arith.constant 0 : index
    %6 = vector.load %arg2[%c0, %5, %c0_1] : memref<1x16x32xf32, #tpu.memory_space<vmem>>, vector<1x8x32xf32>
    %7 = vector.shape_cast %6 : vector<1x8x32xf32> to vector<8x32xf32>
    %c0_2 = arith.constant 0 : index
    %c0_3 = arith.constant 0 : index
    %8 = vector.load %arg3[%c0_2, %c0_3] : memref<40x32xf32, #tpu.memory_space<vmem>>, vector<40x32xf32>
    %9 = tpu.transpose %7, [1, 0] : vector<8x32xf32> -> vector<32x8xf32>
    %cst = arith.constant dense<0.000000e+00> : vector<40x8xf32>
    %10 = tpu.matmul %8, %9, %cst {dimension_numbers = #tpu.dot_dimension_numbers<[1], [0], [0], [1], [0, 0, 1, 1], [], []>} : vector<40x32xf32>, vector<32x8xf32>, vector<40x8xf32> -> vector<40x8xf32>
    %11 = vector.shape_cast %10 : vector<40x8xf32> to vector<5x8x8xf32>
    %12 = tpu.transpose %11, [0, 2, 1] : vector<5x8x8xf32> -> vector<5x8x8xf32>
    %cst_4 = arith.constant 0xFF800000 : f32
    %13 = vector.broadcast %cst_4 : f32 to vector<5x8x1xf32>
    %cst_5 = arith.constant 0.000000e+00 : f32
    %14 = vector.broadcast %cst_5 : f32 to vector<5x8x1xf32>
    %cst_6 = arith.constant 0.000000e+00 : f32
    %15 = vector.broadcast %cst_6 : f32 to vector<5x8x8xf32>
    %c0_7 = arith.constant 0 : index
    %c0_8 = arith.constant 0 : index
    %c0_9 = arith.constant 0 : index
    %16 = vector.load %arg8[%c0_7, %c0_8, %c0_9] : memref<5x8x16xf32, #tpu.memory_space<vmem>>, vector<5x8x8xf32>
    %c0_10 = arith.constant 0 : index
    %c0_11 = arith.constant 0 : index
    %c0_12 = arith.constant 0 : index
    %17 = vector.load %arg9[%c0_10, %c0_11, %c0_12] : memref<5x16x8xf32, #tpu.memory_space<vmem>>, vector<5x8x8xf32>
    "tpu.trace_start"() <{level = 10 : i32, message = "hqd,hdk->hqk"}> : () -> ()
    %cst_13 = arith.constant dense<0.000000e+00> : vector<5x8x8xf32>
    %18 = tpu.matmul %12, %16, %cst_13 {dimension_numbers = #tpu.dot_dimension_numbers<[2], [1], [1], [2], [0, 0, 0, 1, 1, 2], [0], [0]>} : vector<5x8x8xf32>, vector<5x8x8xf32>, vector<5x8x8xf32> -> vector<5x8x8xf32>
    "tpu.trace_stop"() : () -> ()
    %cst_14 = arith.constant dense<0xFF800000> : vector<5x8xf32>
    %19 = vector.multi_reduction <maximumf>, %18, %cst_14 [2] : vector<5x8x8xf32> to vector<5x8xf32>
    %20 = vector.shape_cast %19 : vector<5x8xf32> to vector<5x8x1xf32>
    %21 = arith.maximumf %13, %20 : vector<5x8x1xf32>
    %22 = arith.subf %13, %21 : vector<5x8x1xf32>
    %23 = math.exp %22 : vector<5x8x1xf32>
    %24 = vector.broadcast %21 : vector<5x8x1xf32> to vector<5x8x8xf32>
    %25 = arith.subf %18, %24 : vector<5x8x8xf32>
    %26 = math.exp %25 : vector<5x8x8xf32>
    %27 = arith.mulf %23, %14 : vector<5x8x1xf32>
    %cst_15 = arith.constant dense<0.000000e+00> : vector<5x8xf32>
    %28 = vector.multi_reduction <add>, %26, %cst_15 [2] : vector<5x8x8xf32> to vector<5x8xf32>
    %29 = vector.shape_cast %28 : vector<5x8xf32> to vector<5x8x1xf32>
    %30 = arith.addf %27, %29 : vector<5x8x1xf32>
    %31 = vector.broadcast %23 : vector<5x8x1xf32> to vector<5x8x8xf32>
    %32 = arith.mulf %31, %15 : vector<5x8x8xf32>
    "tpu.trace_start"() <{level = 10 : i32, message = "hqk,hkd->hqd"}> : () -> ()
    %cst_16 = arith.constant dense<0.000000e+00> : vector<5x8x8xf32>
    %33 = tpu.matmul %26, %17, %cst_16 {dimension_numbers = #tpu.dot_dimension_numbers<[2], [1], [1], [2], [0, 0, 0, 1, 1, 2], [0], [0]>} : vector<5x8x8xf32>, vector<5x8x8xf32>, vector<5x8x8xf32> -> vector<5x8x8xf32>
    "tpu.trace_stop"() : () -> ()
    %34 = arith.addf %32, %33 : vector<5x8x8xf32>
    %c0_17 = arith.constant 0 : index
    %c0_18 = arith.constant 0 : index
    %c8 = arith.constant 8 : index
    %35 = vector.load %arg8[%c0_17, %c0_18, %c8] : memref<5x8x16xf32, #tpu.memory_space<vmem>>, vector<5x8x8xf32>
    %c0_19 = arith.constant 0 : index
    %c8_20 = arith.constant 8 : index
    %c0_21 = arith.constant 0 : index
    %36 = vector.load %arg9[%c0_19, %c8_20, %c0_21] : memref<5x16x8xf32, #tpu.memory_space<vmem>>, vector<5x8x8xf32>
    "tpu.trace_start"() <{level = 10 : i32, message = "hqd,hdk->hqk"}> : () -> ()
    %cst_22 = arith.constant dense<0.000000e+00> : vector<5x8x8xf32>
    %37 = tpu.matmul %12, %35, %cst_22 {dimension_numbers = #tpu.dot_dimension_numbers<[2], [1], [1], [2], [0, 0, 0, 1, 1, 2], [0], [0]>} : vector<5x8x8xf32>, vector<5x8x8xf32>, vector<5x8x8xf32> -> vector<5x8x8xf32>
    "tpu.trace_stop"() : () -> ()
    %cst_23 = arith.constant dense<0xFF800000> : vector<5x8xf32>
    %38 = vector.multi_reduction <maximumf>, %37, %cst_23 [2] : vector<5x8x8xf32> to vector<5x8xf32>
    %39 = vector.shape_cast %38 : vector<5x8xf32> to vector<5x8x1xf32>
    %40 = arith.maximumf %21, %39 : vector<5x8x1xf32>
    %41 = arith.subf %21, %40 : vector<5x8x1xf32>
    %42 = math.exp %41 : vector<5x8x1xf32>
    %43 = vector.broadcast %40 : vector<5x8x1xf32> to vector<5x8x8xf32>
    %44 = arith.subf %37, %43 : vector<5x8x8xf32>
    %45 = math.exp %44 : vector<5x8x8xf32>
    %46 = arith.mulf %42, %30 : vector<5x8x1xf32>
    %cst_24 = arith.constant dense<0.000000e+00> : vector<5x8xf32>
    %47 = vector.multi_reduction <add>, %45, %cst_24 [2] : vector<5x8x8xf32> to vector<5x8xf32>
    %48 = vector.shape_cast %47 : vector<5x8xf32> to vector<5x8x1xf32>
    %49 = arith.addf %46, %48 : vector<5x8x1xf32>
    %50 = vector.broadcast %42 : vector<5x8x1xf32> to vector<5x8x8xf32>
    %51 = arith.mulf %50, %34 : vector<5x8x8xf32>
    "tpu.trace_start"() <{level = 10 : i32, message = "hqk,hkd->hqd"}> : () -> ()
    %cst_25 = arith.constant dense<0.000000e+00> : vector<5x8x8xf32>
    %52 = tpu.matmul %45, %36, %cst_25 {dimension_numbers = #tpu.dot_dimension_numbers<[2], [1], [1], [2], [0, 0, 0, 1, 1, 2], [0], [0]>} : vector<5x8x8xf32>, vector<5x8x8xf32>, vector<5x8x8xf32> -> vector<5x8x8xf32>
    "tpu.trace_stop"() : () -> ()
    %53 = arith.addf %51, %52 : vector<5x8x8xf32>
    %54 = tpu.reciprocal %49 : vector<5x8x1xf32> -> vector<5x8x1xf32>
    %55 = vector.broadcast %54 : vector<5x8x1xf32> to vector<5x8x8xf32>
    %56 = arith.mulf %53, %55 : vector<5x8x8xf32>
    %57 = tpu.transpose %56, [0, 2, 1] : vector<5x8x8xf32> -> vector<5x8x8xf32>
    %58 = vector.shape_cast %57 : vector<5x8x8xf32> to vector<40x8xf32>
    %59 = tpu.transpose %58, [1, 0] : vector<40x8xf32> -> vector<8x40xf32>
    %c0_26 = arith.constant 0 : index
    %c0_27 = arith.constant 0 : index
    %60 = vector.load %arg6[%c0_26, %c0_27] : memref<40x32xf32, #tpu.memory_space<vmem>>, vector<40x32xf32>
    %cst_28 = arith.constant dense<0.000000e+00> : vector<8x32xf32>
    %61 = tpu.matmul %59, %60, %cst_28 {dimension_numbers = #tpu.dot_dimension_numbers<[1], [0], [0], [1], [0, 0, 1, 1], [], []>} : vector<8x40xf32>, vector<40x32xf32>, vector<8x32xf32> -> vector<8x32xf32>
    %c0_29 = arith.constant 0 : index
    %c0_30 = arith.constant 0 : index
    %c0_31 = arith.constant 0 : index
    %62 = vector.load %arg7[%c0_29, %c0_30, %c0_31] : memref<1x8x32xf32, #tpu.memory_space<vmem>>, vector<1x8x32xf32>
    %63 = vector.shape_cast %62 : vector<1x8x32xf32> to vector<8x32xf32>
    %64 = vector.shape_cast %61 : vector<8x32xf32> to vector<1x8x32xf32>
    tpu.vector_store %arg7[%c0_29, %c0_30, %c0_31], %64 {strides = array<i32>} : memref<1x8x32xf32, #tpu.memory_space<vmem>>, vector<1x8x32xf32>,
    return
  }
  func.func @transform_0(%arg0: i32, %arg1: i32) -> (i32, i32, i32) {
    %c0_i32 = arith.constant 0 : i32
    %c0_i32_0 = arith.constant 0 : i32
    %c0_i32_1 = arith.constant 0 : i32
    return %arg0, %c0_i32, %c0_i32_0 : i32, i32, i32
  }
  func.func @transform_1(%arg0: i32, %arg1: i32) -> (i32, i32) {
    %c0_i32 = arith.constant 0 : i32
    %c0_i32_0 = arith.constant 0 : i32
    %c0_i32_1 = arith.constant 0 : i32
    return %c0_i32, %c0_i32_0 : i32, i32
  }
  func.func @transform_2(%arg0: i32, %arg1: i32) -> (i32, i32) {
    %c0_i32 = arith.constant 0 : i32
    %c0_i32_0 = arith.constant 0 : i32
    %c0_i32_1 = arith.constant 0 : i32
    return %c0_i32, %c0_i32_0 : i32, i32
  }
  func.func @transform_3(%arg0: i32, %arg1: i32) -> (i32, i32) {
    %c0_i32 = arith.constant 0 : i32
    %c0_i32_0 = arith.constant 0 : i32
    %c0_i32_1 = arith.constant 0 : i32
    return %c0_i32, %c0_i32_0 : i32, i32
  }
  func.func @transform_4(%arg0: i32, %arg1: i32) -> (i32, i32) {
    %c0_i32 = arith.constant 0 : i32
    %c0_i32_0 = arith.constant 0 : i32
    %c0_i32_1 = arith.constant 0 : i32
    return %c0_i32, %c0_i32_0 : i32, i32
  }
  func.func @transform_5(%arg0: i32, %arg1: i32) -> (i32, i32, i32) {
    %c0_i32 = arith.constant 0 : i32
    %c0_i32_0 = arith.constant 0 : i32
    return %arg0, %arg1, %c0_i32 : i32, i32, i32
  }
}

</mosaic_0001>

<bundles_post_ra>
// kernel: tpu_custom_call.1
= control target key start
LH: loop header
LB: loop body
LE: loop exit
PB: predicated region body
PF: predicated region fallthrough
CT: control target
= control target key end

     0   :  { %10 = vsyncpa [#allocation5], 0  ;;  %s3975_s0 = inlined_call_operand.vmem [shape: f32[2,16,32], index: 0, kind: input, shape index: {}]   ;;  %s3976_s1 = inlined_call_operand.vmem [shape: f32[40,32], index: 1, kind: input, shape index: {}]   ;;  %s3977_s2 = inlined_call_operand.vmem [shape: f32[40,32], index: 2, kind: input, shape index: {}]   ;;  %s3978_s3 = inlined_call_operand.vmem [shape: f32[40,32], index: 3, kind: input, shape index: {}]   ;;  %s3979_s4 = inlined_call_operand.vmem [shape: f32[40,32], index: 4, kind: input, shape index: {}]   ;;  %s3980_s5 = inlined_call_operand.hbm [shape: f32[2,16,32], index: 5, kind: output, shape index: {}]  }
   0x1   :  { %12 = vsyncpa [#allocation5 + $0x1], 0  ;;  %s3489_s18 = smov 0   ;;  %s3491_s19 = smov 0  }
   0x2   :  { %s3493_s20 = smov 0   ;;  %s3495_s21 = smov 0  }
   0x3   :  { %s3497_s22 = smov 0   ;;  %s3499_s23 = smov 0  }
   0x4   :  { %s3501_s24 = smov 0   ;;  %s3503_s25 = smov 0  }
   0x5 LB: > { %s2942_s26 = sadd.s32 4294967295, %s3451_s25   ;;  %s2943_s27 = sadd.s32 4294967294, %s3451_s25   ;;  %s3451_s25 = sphi %s3503_s25, %s18_s25   ;;  %s3447_s24 = sphi %s3501_s24, %s3989_s24   ;;  %s3443_s23 = sphi %s3499_s23, %s3988_s23   ;;  %s3439_s22 = sphi %s3497_s22, %s3987_s22   ;;  %s3435_s21 = sphi %s3495_s21, %s3986_s21   ;;  %s3431_s20 = sphi %s3493_s20, %s3985_s20   ;;  %s3427_s19 = sphi %s3491_s19, %s3984_s19   ;;  %s3423_s18 = sphi %s3489_s18, %s3983_s18  }
   0x6   : > { %s27_s28 = sadd.s32 1, %s3443_s23  ;;  %s30_s29 = sadd.s32 1, %s3447_s24 }
   0x7   : > { %p28_p0 = scmp.ge.s32.totalorder %s27_s28, 2  ;;  %p159_p1 = scmp.ne.s32.totalorder %s3431_s20, %s3427_s19 }
   0x8   : > { %p160_p2 = scmp.eq.s32.totalorder %s2942_s26, 3  ;;  %p165_p5 = scmp.ne.s32.totalorder %s3427_s19, %s3423_s18 }
   0x9   : > { %s3991_s28 = smov (%p28_p0, %s27_s28), 0  ;;  %s3993_s29 = smov (!%p28_p0, %s30_s29), %s3447_s24 }
   0xa   : > { %s145_s30 = ssub.s32 %s3443_s23, %s3991_s28  ;;  %p3540_p3 = por %p160_p2, %p159_p1 }
   0xb   : > { %p32_p4 = scmp.ge.s32.totalorder %s3993_s29, 2  ;;  %p166_p6 = scmp.eq.s32.totalorder %s2943_s27, 3 }
   0xc   : > { %p2946_p7 = scmp.ge.s32.totalorder %s3451_s25, 1  ;;  %p204_p9 = scmp.lt.s32.totalorder %s3451_s25, 5 }
   0xd   : > { %s3995_s29 = smov (%p32_p4, %s3993_s29), 0  ;;  %p3549_p8 = por %p166_p6, %p165_p5 }
   0xe   : > { %s144_s8 = ssub.s32 %s3447_s24, %s3995_s29  ;;  %s149_s9 = sadd.s32 1, %s3431_s20 }
   0xf   : > { %s146_s10 = sor.u32 %s145_s30, %s144_s8  ;;  %p205_p10 = pnand %p2946_p7, %p204_p9 }
  0x10   : > { %p147_p11 = scmp.eq.s32.totalorder %s146_s10, 0  ;;  %s229_s12 = sand.u32 (!%p205_p10), 1, %s3427_s19  }
  0x11   : > { %208 = sbr.rel (%p205_p10) target bundleno = 2118 (0x846), region = 40  ;;  %p232_p12 = scmp.lt.s32.totalorder (!%p205_p10), %s3439_s22, 1 }
  0x12   : > { %s3558_s11 = scalar_select %p147_p11, %s3431_s20, %s149_s9  }
  0x13   : > { %s3564_s13 = sshll.u32 (!%p205_p10), %s229_s12, 3  ;;  %p2950_p13 = scmp.ne.s32.totalorder (!%p205_p10), %s3435_s21, 0 }
  0x14   : > { %s231_s27 = scalar_lea.vmem (!%p205_p10), [#allocation4], %s3564_s13 }
  0x16   : > { %s233_s14 = scalar_select %p232_p12, %s3439_s22, 1 }
  0x17   : > { %240 = sbr.rel (%p2950_p13) target bundleno = 376 (0x178), region = 44 }
  0x18   : > { %s2998_s15 = sshll.u32 %s233_s14, 4 }
  0x19   : > { %s3570_s26 = scalar_lea.vmem %s3975_s0, %s2998_s15 }
  0x1c   : > { %v242_v0 = vld [vmem:[%s3570_s26 + $0x8] sm:$0xff]  ;;  %vm248_vm0 = vcmask 261120   ;;  %v3453_v1 = vmov 0.0   ;;  %vm3454_vm1 = vmmov 0   ;;  %v241_v2 = vld [vmem:[%s3570_s26] sm:$0xff]  ;;  %v368_v7 = vld [vmem:[%s3978_s3 + $0x10] sm:$0xff] }
  0x1d   : > { %3084 = vmatprep.subr.mxu1 %v3453_v1  ;;  %3088 = vmatprep.mubr.msk.f32.mxu1 %vm3454_vm1, %v3453_v1  ;;  %v366_v3 = vld [vmem:[%s3978_s3] sm:$0xff]  ;;  %v367_v5 = vld [vmem:[%s3978_s3 + $0x8] sm:$0xff]  ;;  %v245_v8 = vld [vmem:[%s3977_s2 + $0x10] sm:$0xff]  ;;  %vm360_vm2 = vcmask 130048   ;;  %vm636_vm3 = vcmask 64512  }
  0x1e   : > { %3085 = vmatpush3.xpose.msk.msra.mxu1 %vm248_vm0, %v242_v0  ;;  %3065 = vmatprep.subr.mxu0 %v3453_v1  ;;  %v243_v4 = vld [vmem:[%s3977_s2] sm:$0xff]  ;;  %v244_v6 = vld [vmem:[%s3977_s2 + $0x8] sm:$0xff]  ;;  %v369_v9 = vld [vmem:[%s3978_s3 + $0x18] sm:$0xff] }
  0x1f   : > { %3086 = vmatprep.subr.mxu1 %v3453_v1  ;;  %3066 = vmatpush3.xpose.msk.msra.mxu0 %vm248_vm0, %v242_v0  ;;  %v246_v10 = vld [vmem:[%s3977_s2 + $0x18] sm:$0xff]  ;;  %v370_v11 = vld [vmem:[%s3978_s3 + $0x20] sm:$0xff] }
  0x20   : > { %3067 = vmatprep.subr.mxu0 %v3453_v1  ;;  %3069 = vmatprep.mubr.msk.f32.mxu0 %vm3454_vm1, %v3453_v1  ;;  %v247_v12 = vld [vmem:[%s3977_s2 + $0x20] sm:$0xff] }
  0x22   : > { %3087 = vmatpush3.xpose.msk.msra.mxu1 %vm248_vm0, %v241_v2 }
  0x23   : > { %3068 = vmatpush3.xpose.msk.msra.mxu0 %vm248_vm0, %v241_v2 }
  0x25   : > { %3089 = vmatmul.mubr.msk.f32.vlgmr.msra.gmra.mxu1 %vm248_vm0, %v366_v3 }
  0x26   : > { %3091 = vmatprep.mubr.msk.f32.mxu1 %vm3454_vm1, %v3453_v1  ;;  %3070 = vmatmul.mubr.msk.f32.vlgmr.msra.gmra.mxu0 %vm248_vm0, %v243_v4 }
  0x27   : > { %3072 = vmatprep.mubr.msk.f32.mxu0 %vm3454_vm1, %v3453_v1 }
  0x29   : > { %3092 = vmatmul.mubr.msk.f32.gmra.mxu1 %vm248_vm0, %v367_v5 }
  0x2a   : > { %3094 = vmatprep.mubr.msk.f32.mxu1 %vm3454_vm1, %v3453_v1  ;;  %3073 = vmatmul.mubr.msk.f32.gmra.mxu0 %vm248_vm0, %v244_v6 }
  0x2b   : > { %3075 = vmatprep.mubr.msk.f32.mxu0 %vm3454_vm1, %v3453_v1 }
  0x2d   : > { %3095 = vmatmul.mubr.msk.f32.gmra.mxu1 %vm248_vm0, %v368_v7 }
  0x2e   : > { %3097 = vmatprep.mubr.msk.f32.mxu1 %vm3454_vm1, %v3453_v1  ;;  %3076 = vmatmul.mubr.msk.f32.gmra.mxu0 %vm248_vm0, %v245_v8 }
  0x2f   : > { %3078 = vmatprep.mubr.msk.f32.mxu0 %vm3454_vm1, %v3453_v1 }
  0x31   : > { %3098 = vmatmul.mubr.msk.f32.gmra.mxu1 %vm248_vm0, %v369_v9 }
  0x32   : > { %3100 = vmatprep.mubr.msk.f32.mxu1 %vm3454_vm1, %v3453_v1  ;;  %3079 = vmatmul.mubr.msk.f32.gmra.mxu0 %vm248_vm0, %v246_v10 }
  0x33   : > { %3081 = vmatprep.mubr.msk.f32.mxu0 %vm3454_vm1, %v3453_v1 }
  0x35   : > { %3101 = vmatmul.mubr.msk.f32.gmra.mxu1 %vm248_vm0, %v370_v11 }
  0x36   : > { %3082 = vmatmul.mubr.msk.f32.gmra.mxu0 %vm248_vm0, %v247_v12 }
  0xe5   : > { %v452_v13 = vpop.f32.mrf.mxu1 }
  0xe6   : > { %476 = vxpose.xlu0.b32.start.end [1/1] (short) (narrow) %v452_v13, 16  ;;  %v336_v14 = vpop.f32.mrf.mxu0 }
  0xe7   : > { %v3090_v15 = vpop.f32.mrf.mxu1  ;;  %361 = vst.msk [vmem:[#allocation2] sm:$0xff] %vm360_vm2, %v336_v14 }
  0xe8   : > { %v3071_v16 = vpop.f32.mrf.mxu0 }
  0xe9   : > { %v457_v17 = vpop.f32.mrf.mxu1 }
  0xea   : > { %v341_v18 = vpop.f32.mrf.mxu0 }
  0xeb   : > { %508 = vxpose.xlu0.b32.start.end [1/1] (short) (narrow) %v457_v17, 16  ;;  %v3093_v19 = vpop.f32.mrf.mxu1  ;;  %362 = vst.msk [vmem:[#allocation2 + $0x8] sm:$0xff] %vm360_vm2, %v341_v18 }
  0xec   : > { %v3074_v20 = vpop.f32.mrf.mxu0 }
  0xed   : > { %v462_v21 = vpop.f32.mrf.mxu1 }
  0xee   : > { %540 = vxpose.xlu1.b32.start.end [1/1] (short) (narrow) %v462_v21, 16  ;;  %v346_v22 = vpop.f32.mrf.mxu0 }
  0xef   : > { %v3096_v23 = vpop.f32.mrf.mxu1  ;;  %363 = vst.msk [vmem:[#allocation2 + $0x10] sm:$0xff] %vm360_vm2, %v346_v22 }
  0xf0   : > { %v3077_v24 = vpop.f32.mrf.mxu0 }
  0xf1   : > { %v467_v25 = vpop.f32.mrf.mxu1 }
  0xf2   : > { %v351_v26 = vpop.f32.mrf.mxu0 }
  0xf3   : > { %572 = vxpose.xlu1.b32.start.end [1/1] (short) (narrow) %v467_v25, 16  ;;  %v3099_v27 = vpop.f32.mrf.mxu1  ;;  %364 = vst.msk [vmem:[#allocation2 + $0x18] sm:$0xff] %vm360_vm2, %v351_v26 }
  0xf4   : > { %v3080_v28 = vpop.f32.mrf.mxu0 }
  0xf5   : > { %v472_v29 = vpop.f32.mrf.mxu1 }
  0xf6   : > { %604 = vxpose.xlu0.b32.start.end [1/1] (short) (narrow) %v472_v29, 16  ;;  %v356_v30 = vpop.f32.mrf.mxu0 }
  0xf7   : > { %v3102_v31 = vpop.f32.mrf.mxu1  ;;  %365 = vst.msk [vmem:[#allocation2 + $0x20] sm:$0xff] %vm360_vm2, %v356_v30 }
  0xf8   : > { %v3083_v32 = vpop.f32.mrf.mxu0 }
 0x162   : > { %v492_v33 = vpop.trf.xlu0 }
 0x163   : > { %637 = vst.msk [vmem:[#allocation3] sm:$0xff] %vm636_vm3, %v492_v33 }
 0x166   : > { %v493_v34 = vpop.trf.xlu0 }
 0x167   : > { %638 = vst.msk [vmem:[#allocation3 + $0x8] sm:$0xff] %vm636_vm3, %v493_v34 }
 0x16a   : > { %v524_v35 = vpop.trf.xlu0  ;;  %v556_v36 = vpop.trf.xlu1 }
 0x16b   : > { %639 = vst.msk [vmem:[#allocation3 + $0x10] sm:$0xff] %vm636_vm3, %v524_v35  ;;  %641 = vst.msk [vmem:[#allocation3 + $0x20] sm:$0xff] %vm636_vm3, %v556_v36 }
 0x16e   : > { %v525_v37 = vpop.trf.xlu0  ;;  %v557_v38 = vpop.trf.xlu1 }
 0x16f   : > { %640 = vst.msk [vmem:[#allocation3 + $0x18] sm:$0xff] %vm636_vm3, %v525_v37  ;;  %642 = vst.msk [vmem:[#allocation3 + $0x28] sm:$0xff] %vm636_vm3, %v557_v38 }
 0x172   : > { %v588_v39 = vpop.trf.xlu1  ;;  %v620_v40 = vpop.trf.xlu0 }
 0x173   : > { %643 = vst.msk [vmem:[#allocation3 + $0x30] sm:$0xff] %vm636_vm3, %v588_v39  ;;  %645 = vst.msk [vmem:[#allocation3 + $0x40] sm:$0xff] %vm636_vm3, %v620_v40 }
 0x176   : > { %v589_v41 = vpop.trf.xlu1  ;;  %v621_v42 = vpop.trf.xlu0 }
 0x177   : > { %644 = vst.msk [vmem:[#allocation3 + $0x38] sm:$0xff] %vm636_vm3, %v589_v41  ;;  %646 = vst.msk [vmem:[#allocation3 + $0x48] sm:$0xff] %vm636_vm3, %v621_v42 }
 0x178 PF: > { %s2965_s14 = sshll.u32 %s3435_s21, 3  ;;  %vm655_vm4 = vcmask 261120   ;;  %v3455_v43 = vmov 0.0   ;;  %vm3456_vm5 = vmmov 0   ;;  %v650_v45 = vld [vmem:[%s3976_s1] sm:$0xff]  ;;  %v651_v46 = vld [vmem:[%s3976_s1 + $0x8] sm:$0xff] }
 0x179   : > { %3103 = vmatprep.subr.mxu0 %v3455_v43  ;;  %s648_s15 = scalar_lea.vmem %s3570_s26, %s2965_s14  ;;  %3105 = vmatprep.mubr.msk.f32.mxu0 %vm3456_vm5, %v3455_v43  ;;  %v652_v47 = vld [vmem:[%s3976_s1 + $0x10] sm:$0xff]  ;;  %v653_v48 = vld [vmem:[%s3976_s1 + $0x18] sm:$0xff]  ;;  %v654_v49 = vld [vmem:[%s3976_s1 + $0x20] sm:$0xff]  ;;  %vm934_vm6 = vcmask 64512   ;;  %s3457_s17 = smov 120   ;;  %vm2777_vm7 = vcmask 326656  }
 0x17a   : > { %v649_v44 = vld [vmem:[%s648_s15] sm:$0xff]  ;;  %3120 = vmatprep.subr.mxu1 %v3455_v43  ;;  %3122 = vmatprep.mubr.msk.f32.mxu1 %vm3456_vm5, %v3455_v43  ;;  %v925_v61 = vld [vmem:[#allocation2 + $0x8] sm:$0xff]  ;;  %v926_v63 = vld [vmem:[#allocation2 + $0x10] sm:$0xff]  ;;  %s2994_s30 = sshll.u32 %s3439_s22, 1  ;;  %s2868_s10 = sshll.u32 %s231_s27, 4  ;;  %s3920_s10 = int_to_ptr.vmem [resolvable:$true] %s2868_s10 }
 0x17b   : > { %3104 = vmatpush3.xpose.msk.msra.mxu0 %vm655_vm4, %v649_v44  ;;  %v3685_v50 = vld [vmem:[#allocation2] sm:$0xff]  ;;  %v927_v1 = vld [vmem:[#allocation2 + $0x18] sm:$0xff]  ;;  %v929_v18 = vld [vmem:[#allocation3] sm:$0xff]  ;;  %s2864_s8 = sadd.s32 %s3435_s21, %s2994_s30  ;;  %s2853_s21 = scalar_lea.sflag [#allocation5], %s229_s12 }
 0x17c   : > { %3160 = vmatprep.subr.mxu0 %v3455_v43  ;;  %3121 = vmatpush3.msra.mxu1 %v3685_v50  ;;  %v928_v3 = vld [vmem:[#allocation2 + $0x20] sm:$0xff]  ;;  %v932_v22 = vld [vmem:[#allocation3 + $0x30] sm:$0xff]  ;;  %v931_v31 = vld [vmem:[#allocation3 + $0x20] sm:$0xff]  ;;  %s2995_s9 = sshll.u32 %s2864_s8, 7  ;;  %s3359_s22 = scalar_lea.vmem %s3920_s10, 128 }
 0x17d   : > { %3125 = vmatprep.subr.mxu1 %v3455_v43  ;;  %v930_v29 = vld [vmem:[#allocation3 + $0x10] sm:$0xff]  ;;  %v933_v44 = vld [vmem:[#allocation3 + $0x40] sm:$0xff]  ;;  %s3918_s16 = scalar_lea.hbm %s3980_s5, %s2995_s9  ;;  %p3360_p0 = scmp.ne.s32.totalorder %s3920_s10, %s3359_s22 }
 0x17e   : > { %3106 = vmatmul.mubr.msk.f32.vlgmr.msra.gmra.mxu0 %vm655_vm4, %v650_v45 }
 0x17f   : > { %3108 = vmatprep.mubr.msk.f32.mxu0 %vm3456_vm5, %v3455_v43  ;;  %3161 = vmatpush3.msra.mxu0 %v932_v22  ;;  %p3361_p1 = pnand %p3360_p0, %p3540_p3 }
 0x180   : > { %3170 = vmatprep.subr.mxu0 %v3455_v43 }
 0x181   : > { %p3362_p2 = pneg %p3361_p1 }
 0x182   : > { %3109 = vmatmul.mubr.msk.f32.gmra.mxu0 %vm655_vm4, %v651_v46 }
 0x183   : > { %3111 = vmatprep.mubr.msk.f32.mxu0 %vm3456_vm5, %v3455_v43 }
 0x186   : > { %3112 = vmatmul.mubr.msk.f32.gmra.mxu0 %vm655_vm4, %v652_v47 }
 0x187   : > { %3114 = vmatprep.mubr.msk.f32.mxu0 %vm3456_vm5, %v3455_v43 }
 0x18a   : > { %3115 = vmatmul.mubr.msk.f32.gmra.mxu0 %vm655_vm4, %v653_v48 }
 0x18b   : > { %3117 = vmatprep.mubr.msk.f32.mxu0 %vm3456_vm5, %v3455_v43 }
 0x18e   : > { %3118 = vmatmul.mubr.msk.f32.gmra.mxu0 %vm655_vm4, %v654_v49 }
 0x18f   : > { %3162 = vmatprep.mubr.msk.f32.mxu0 %vm3456_vm5, %v3455_v43 }
 0x23e   : > { %v740_v51 = vpop.f32.mrf.mxu0 }
 0x23f   : > { %764 = vxpose.xlu0.b32.start.end [1/1] (short) (narrow) %v740_v51, 8 }
 0x240   : > { %v3107_v52 = vpop.f32.mrf.mxu0 }
 0x242   : > { %v745_v53 = vpop.f32.mrf.mxu0 }
 0x243   : > { %796 = vxpose.xlu0.b32.start.end [1/1] (short) (narrow) %v745_v53, 8 }
 0x244   : > { %v3110_v54 = vpop.f32.mrf.mxu0 }
 0x246   : > { %v750_v55 = vpop.f32.mrf.mxu0 }
 0x247   : > { %828 = vxpose.xlu1.b32.start.end [1/1] (short) (narrow) %v750_v55, 8 }
 0x248   : > { %v3113_v56 = vpop.f32.mrf.mxu0 }
 0x24a   : > { %v755_v57 = vpop.f32.mrf.mxu0 }
 0x24b   : > { %860 = vxpose.xlu1.b32.start.end [1/1] (short) (narrow) %v755_v57, 8 }
 0x24c   : > { %v3116_v58 = vpop.f32.mrf.mxu0 }
 0x24e   : > { %v760_v59 = vpop.f32.mrf.mxu0 }
 0x24f   : > { %892 = vxpose.xlu0.b32.start.end [1/1] (short) (narrow) %v760_v59, 8 }
 0x250   : > { %v3119_v60 = vpop.f32.mrf.mxu0 }
 0x2bb   : > { %v3689_v62 = vpop.trf.xlu0 }
 0x2bc   : > { %3123 = vmatmul.mubr.msk.f32.vlgmr.msra.gmra.mxu1 %vm934_vm6, %v3689_v62 }
 0x2bd   : > { %3126 = vmatpush3.msra.mxu1 %v925_v61  ;;  %3127 = vmatprep.mubr.msk.f32.mxu1 %vm3456_vm5, %v3455_v43 }
 0x2be   : > { %3130 = vmatprep.subr.mxu1 %v3455_v43 }
 0x2bf   : > { %v3696_v0 = vpop.trf.xlu0 }
 0x2c0   : > { %3128 = vmatmul.mubr.msk.f32.vlgmr.msra.gmra.mxu1 %vm934_vm6, %v3696_v0 }
 0x2c1   : > { %3131 = vmatpush3.msra.mxu1 %v926_v63  ;;  %3132 = vmatprep.mubr.msk.f32.mxu1 %vm3456_vm5, %v3455_v43 }
 0x2c2   : > { %3135 = vmatprep.subr.mxu1 %v3455_v43 }
 0x2c3   : > { %v3703_v2 = vpop.trf.xlu1 }
 0x2c4   : > { %3133 = vmatmul.mubr.msk.f32.vlgmr.msra.gmra.mxu1 %vm934_vm6, %v3703_v2 }
 0x2c5   : > { %3136 = vmatpush3.msra.mxu1 %v927_v1  ;;  %3137 = vmatprep.mubr.msk.f32.mxu1 %vm3456_vm5, %v3455_v43 }
 0x2c6   : > { %3140 = vmatprep.subr.mxu1 %v3455_v43 }
 0x2c7   : > { %v3710_v4 = vpop.trf.xlu1 }
 0x2c8   : > { %3138 = vmatmul.mubr.msk.f32.vlgmr.msra.gmra.mxu1 %vm934_vm6, %v3710_v4 }
 0x2c9   : > { %3141 = vmatpush3.msra.mxu1 %v928_v3  ;;  %3142 = vmatprep.mubr.msk.f32.mxu1 %vm3456_vm5, %v3455_v43 }
 0x2ca   : > { %3145 = vmatprep.subr.mxu1 %v3455_v43 }
 0x2cb   : > { %v3717_v5 = vpop.trf.xlu0 }
 0x2cc   : > { %3143 = vmatmul.mubr.msk.f32.vlgmr.msra.gmra.mxu1 %vm934_vm6, %v3717_v5 }
 0x2cd   : > { %3147 = vmatprep.mubr.msk.f32.mxu1 %vm3456_vm5, %v3455_v43  ;;  %3146 = vmatpush3.msra.mxu1 %v929_v18  ;;  %v1745_v18 = vld [vmem:[#allocation3 + $0x8] sm:$0xff] }
 0x2ce   : > { %3150 = vmatprep.subr.mxu1 %v3455_v43 }
 0x37c   : > { %v1004_v6 = vpop.f32.mrf.mxu1 }
 0x37d   : > { %v1300_v7 = vsel %vm934_vm6, %v1004_v6, -inf }
 0x37e   : > { %v3124_v8 = vpop.f32.mrf.mxu1  ;;  %1301 = vmax.xlane.f32.xlu1 %v1300_v7 }
 0x380   : > { %v1077_v9 = vpop.f32.mrf.mxu1 }
 0x381   : > { %v1303_v10 = vsel %vm934_vm6, %v1077_v9, -inf }
 0x382   : > { %1304 = vmax.xlane.f32.xlu0 %v1303_v10  ;;  %v3129_v11 = vpop.f32.mrf.mxu1 }
 0x384   : > { %v1150_v12 = vpop.f32.mrf.mxu1 }
 0x385   : > { %v1306_v19 = vsel %vm934_vm6, %v1150_v12, -inf }
 0x386   : > { %v3134_v13 = vpop.f32.mrf.mxu1 }
 0x388   : > { %v1223_v14 = vpop.f32.mrf.mxu1 }
 0x389   : > { %v1309_v20 = vsel %vm934_vm6, %v1223_v14, -inf }
 0x38a   : > { %v3139_v15 = vpop.f32.mrf.mxu1 }
 0x38c   : > { %v1296_v16 = vpop.f32.mrf.mxu1 }
 0x38d   : > { %v1312_v21 = vsel %vm934_vm6, %v1296_v16, -inf }
 0x38e   : > { %v3144_v17 = vpop.f32.mrf.mxu1 }
 0x38f   : > { %1825 = vrot.lane.b32.xlu1 %v925_v61, %s3457_s17 }
 0x398   : > { %1751 = vrot.lane.b32.xlu0 %v3685_v50, %s3457_s17 }
 0x39c   : > { %1973 = vrot.lane.b32.xlu0 %v927_v1, %s3457_s17 }
 0x3b3   : > { %1307 = vmax.xlane.f32.xlu1 %v1306_v19  ;;  %v1746_v19 = vld [vmem:[#allocation3 + $0x18] sm:$0xff] }
 0x3b7   : > { %1310 = vmax.xlane.f32.xlu1 %v1309_v20 }
 0x3bb   : > { %1313 = vmax.xlane.f32.xlu1 %v1312_v21 }
 0x3cc   : > { %1899 = vrot.lane.b32.xlu1 %v926_v63, %s3457_s17 }
 0x3d0   : > { %2047 = vrot.lane.b32.xlu1 %v928_v3, %s3457_s17  ;;  %s3458_s17 = smov [#allocation4]  }
 0x3d1   : > { %s3363_s26 = sshll.u32 %s3458_s17, 4  ;;  %s3364_s26 = int_to_ptr.vmem [resolvable:$false] %s3363_s26 }
 0x3d2   : > { %s3365_s30 = scalar_lea.vmem %s3364_s26, 256  ;;  %p3366_p4 = scmp.lt.s32.totalorder %s3920_s10, %s3364_s26 }
 0x3d3   : > { %p3367_p5 = scmp.lt.s32.totalorder %s3365_s30, %s3359_s22 }
 0x3d5   : > { %p3368_p6 = por %p3367_p5, %p3366_p4 }
 0x3d7   : > { %p3369_p7 = pnand %p3368_p6, %p3362_p2 }
 0x407   : > { %v3731_v23 = vpop.xlane.xlu1 %1301 }
 0x408   : > { %v1330_v24 = vsub.f32 %v1004_v6, %v3731_v23  ;;  %v1315_v20 = vsub.f32 -inf, %v3731_v23 }
 0x40a   : > { %v1335_v25 = vmul.f32 1.442695, %v1330_v24  ;;  %v1320_v24 = vmul.f32 1.442695, %v1315_v20 }
 0x40b   : > { %v3734_v26 = vpop.xlane.xlu0 %1304  ;;  %v1826_v33 = vpop.permute.xlu1 %1825 }
 0x40c   : > { %3309 = vpow2.f32 %v1335_v25  ;;  %v1331_v27 = vsub.f32 %v1077_v9, %v3734_v26  ;;  %v1316_v21 = vsub.f32 -inf, %v3734_v26 }
 0x40e   : > { %v1337_v28 = vmul.f32 1.442695, %v1331_v27  ;;  %v1322_v27 = vmul.f32 1.442695, %v1316_v21 }
 0x40f   : > { %v1752_v46 = vpop.permute.xlu0 %1751 }
 0x410   : > { %3311 = vpow2.f32 %v1337_v28 }
 0x413   : > { %v1974_v50 = vpop.permute.xlu0 %1973 }
 0x419   : > { %v3737_v30 = vpop.eup %3309 }
 0x41a   : > { %3148 = vmatmul.mubr.msk.f32.vlgmr.msra.gmra.mxu1 %vm934_vm6, %v3737_v30  ;;  %v1350_v13 = vsel %vm934_vm6, %v3737_v30, 0.0 }
 0x41b   : > { %3151 = vmatpush3.msra.mxu1 %v930_v29  ;;  %3152 = vmatprep.mubr.msk.f32.mxu1 %vm3456_vm5, %v3455_v43 }
 0x41c   : > { %3155 = vmatprep.subr.mxu1 %v3455_v43 }
 0x41d   : > { %v3744_v32 = vpop.eup %3311 }
 0x41e   : > { %3153 = vmatmul.mubr.msk.f32.vlgmr.msra.gmra.mxu1 %vm934_vm6, %v3744_v32 }
 0x41f   : > { %3156 = vmatpush3.msra.mxu1 %v931_v31  ;;  %3157 = vmatprep.mubr.msk.f32.mxu1 %vm3456_vm5, %v3455_v43 }
 0x420   : > { %3165 = vmatprep.subr.mxu1 %v3455_v43 }
 0x43c   : > { %v3751_v34 = vpop.xlane.xlu1 %1307 }
 0x43d   : > { %v1332_v35 = vsub.f32 %v1150_v12, %v3751_v34  ;;  %v1317_v22 = vsub.f32 -inf, %v3751_v34 }
 0x43f   : > { %v1339_v36 = vmul.f32 1.442695, %v1332_v35  ;;  %v1324_v28 = vmul.f32 1.442695, %v1317_v22 }
 0x440   : > { %v3754_v37 = vpop.xlane.xlu1 %1310 }
 0x441   : > { %3313 = vpow2.f32 %v1339_v36  ;;  %v1333_v38 = vsub.f32 %v1223_v14, %v3754_v37  ;;  %v1353_v14 = vsel %vm934_vm6, %v3744_v32, 0.0  ;;  %v1318_v25 = vsub.f32 -inf, %v3754_v37 }
 0x443   : > { %v1341_v39 = vmul.f32 1.442695, %v1333_v38  ;;  %v1326_v31 = vmul.f32 1.442695, %v1318_v25 }
 0x444   : > { %v3757_v40 = vpop.xlane.xlu1 %1313 }
 0x445   : > { %3315 = vpow2.f32 %v1341_v39  ;;  %v1334_v41 = vsub.f32 %v1296_v16, %v3757_v40  ;;  %v1319_v32 = vsub.f32 -inf, %v3757_v40 }
 0x447   : > { %v1343_v42 = vmul.f32 1.442695, %v1334_v41 }
 0x448   : > { %v1900_v48 = vpop.permute.xlu1 %1899 }
 0x449   : > { %3317 = vpow2.f32 %v1343_v42 }
 0x44a   : > { %3319 = vpow2.f32 %v1320_v24  ;;  %v1749_v24 = vld [vmem:[#allocation3 + $0x48] sm:$0xff] }
 0x44b   : > { %3321 = vpow2.f32 %v1322_v27 }
 0x44c   : > { %v2048_v51 = vpop.permute.xlu1 %2047  ;;  %3323 = vpow2.f32 %v1324_v28 }
 0x44d   : > { %3325 = vpow2.f32 %v1326_v31 }
 0x44e   : > { %v3760_v45 = vpop.eup %3313 }
 0x44f   : > { %3158 = vmatmul.mubr.msk.f32.vlgmr.msra.gmra.mxu1 %vm934_vm6, %v3760_v45  ;;  %v1356_v15 = vsel %vm934_vm6, %v3760_v45, 0.0  ;;  %v1328_v45 = vmul.f32 1.442695, %v1319_v32 }
 0x450   : > { %3166 = vmatpush3.msra.mxu1 %v933_v44  ;;  %3167 = vmatprep.mubr.msk.f32.mxu1 %vm3456_vm5, %v3455_v43 }
 0x451   : > { %3175 = vmatprep.subr.mxu1 %v3455_v43 }
 0x452   : > { %v3767_v47 = vpop.eup %3315 }
 0x453   : > { %3163 = vmatmul.mubr.msk.f32.vlgmr.msra.gmra.mxu0 %vm934_vm6, %v3767_v47  ;;  %v1359_v16 = vsel %vm934_vm6, %v3767_v47, 0.0 }
 0x454   : > { %3171 = vmatpush3.msra.mxu0 %v1752_v46  ;;  %3172 = vmatprep.mubr.msk.f32.mxu0 %vm3456_vm5, %v3455_v43 }
 0x455   : > { %3180 = vmatprep.subr.mxu0 %v3455_v43 }
 0x456   : > { %v3318_v49 = vpop.eup %3317 }
 0x457   : > { %3168 = vmatmul.mubr.msk.f32.vlgmr.msra.gmra.mxu1 %vm934_vm6, %v3318_v49  ;;  %3173 = vmatmul.mubr.msk.f32.vlgmr.msra.gmra.mxu0 %vm934_vm6, %v3689_v62  ;;  %v1362_v17 = vsel %vm934_vm6, %v3318_v49, 0.0 }
 0x458   : > { %3176 = vmatpush3.msra.mxu1 %v1826_v33  ;;  %3177 = vmatprep.mubr.msk.f32.mxu1 %vm3456_vm5, %v3455_v43 }
 0x459   : > { %3181 = vmatpush3.msra.mxu0 %v1900_v48  ;;  %3182 = vmatprep.mubr.msk.f32.mxu0 %vm3456_vm5, %v3455_v43 }
 0x45a   : > { %3185 = vmatprep.subr.mxu1 %v3455_v43  ;;  %3190 = vmatprep.subr.mxu0 %v3455_v43 }
 0x45b   : > { %3178 = vmatmul.mubr.msk.f32.vlgmr.msra.gmra.mxu1 %vm934_vm6, %v3696_v0  ;;  %3183 = vmatmul.mubr.msk.f32.vlgmr.msra.gmra.mxu0 %vm934_vm6, %v3703_v2 }
 0x45c   : > { %3186 = vmatpush3.msra.mxu1 %v1974_v50  ;;  %3187 = vmatprep.mubr.msk.f32.mxu1 %vm3456_vm5, %v3455_v43 }
 0x45d   : > { %3191 = vmatpush3.msra.mxu0 %v2048_v51  ;;  %3192 = vmatprep.mubr.msk.f32.mxu0 %vm3456_vm5, %v3455_v43 }
 0x45e   : > { %3195 = vmatprep.subr.mxu1 %v3455_v43  ;;  %3200 = vmatprep.subr.mxu0 %v3455_v43 }
 0x45f   : > { %3188 = vmatmul.mubr.msk.f32.vlgmr.msra.gmra.mxu1 %vm934_vm6, %v3710_v4  ;;  %3193 = vmatmul.mubr.msk.f32.vlgmr.msra.gmra.mxu0 %vm934_vm6, %v3717_v5 }
 0x460   : > { %3197 = vmatprep.mubr.msk.f32.mxu1 %vm3456_vm5, %v3455_v43  ;;  %3202 = vmatprep.mubr.msk.f32.mxu0 %vm3456_vm5, %v3455_v43 }
 0x461   : > { %3196 = vmatpush3.msra.mxu1 %v1745_v18  ;;  %3201 = vmatpush3.msra.mxu0 %v1746_v19 }
 0x462   : > { %3205 = vmatprep.subr.mxu1 %v3455_v43  ;;  %3210 = vmatprep.subr.mxu0 %v3455_v43 }
 0x4da   : > { %v3801_v52 = vpop.f32.mrf.mxu1 }
 0x4dc   : > { %v3149_v53 = vpop.f32.mrf.mxu1 }
 0x4de   : > { %v3803_v54 = vpop.f32.mrf.mxu1 }
 0x4e0   : > { %v3154_v55 = vpop.f32.mrf.mxu1 }
 0x50f   : > { %v3805_v56 = vpop.f32.mrf.mxu1 }
 0x511   : > { %v3159_v57 = vpop.f32.mrf.mxu1 }
 0x513   : > { %v3807_v58 = vpop.f32.mrf.mxu0 }
 0x515   : > { %v3164_v59 = vpop.f32.mrf.mxu0 }
 0x517   : > { %v3809_v60 = vpop.f32.mrf.mxu1  ;;  %v1820_v61 = vpop.f32.mrf.mxu0 }
 0x518   : > { %v2120_v62 = vsel %vm934_vm6, %v1820_v61, -inf }
 0x519   : > { %v3169_v63 = vpop.f32.mrf.mxu1  ;;  %2121 = vmax.xlane.f32.xlu0 %v2120_v62  ;;  %v3174_v0 = vpop.f32.mrf.mxu0 }
 0x51b   : > { %v3812_v1 = vpop.f32.mrf.mxu1  ;;  %v3814_v2 = vpop.f32.mrf.mxu0 }
 0x51c   : > { %v2123_v3 = vsel %vm934_vm6, %v3812_v1, -inf  ;;  %v2126_v4 = vsel %vm934_vm6, %v3814_v2, -inf }
 0x51d   : > { %2124 = vmax.xlane.f32.xlu1 %v2123_v3  ;;  %v3179_v5 = vpop.f32.mrf.mxu1  ;;  %2127 = vmax.xlane.f32.xlu0 %v2126_v4  ;;  %v3184_v6 = vpop.f32.mrf.mxu0 }
 0x51f   : > { %v3820_v7 = vpop.f32.mrf.mxu1  ;;  %v3822_v8 = vpop.f32.mrf.mxu0 }
 0x520   : > { %v2129_v9 = vsel %vm934_vm6, %v3820_v7, -inf  ;;  %v2132_v10 = vsel %vm934_vm6, %v3822_v8, -inf }
 0x521   : > { %v3189_v11 = vpop.f32.mrf.mxu1  ;;  %2130 = vmax.xlane.f32.xlu0 %v2129_v9  ;;  %2133 = vmax.xlane.f32.xlu1 %v2132_v10  ;;  %v3194_v12 = vpop.f32.mrf.mxu0  ;;  %v1747_v10 = vld [vmem:[#allocation3 + $0x28] sm:$0xff] }
 0x525   : > { %1351 = vadd.xlane.f32.xlu0 %v1350_v13  ;;  %1354 = vadd.xlane.f32.xlu1 %v1353_v14 }
 0x529   : > { %1357 = vadd.xlane.f32.xlu0 %v1356_v15 }
 0x52d   : > { %1360 = vadd.xlane.f32.xlu0 %v1359_v16 }
 0x531   : > { %1363 = vadd.xlane.f32.xlu0 %v1362_v17 }
 0x5a2   : > { %v2122_v29 = vpop.xlane.xlu0 %2121 }
 0x5a3   : > { %v2135_v30 = vmax.f32 %v3731_v23, %v2122_v29 }
 0x5a5   : > { %v2140_v33 = vsub.f32 %v3731_v23, %v2135_v30  ;;  %v2155_v35 = vsub.f32 %v1820_v61, %v2135_v30 }
 0x5a6   : > { %v2125_v36 = vpop.xlane.xlu1 %2124  ;;  %v2128_v38 = vpop.xlane.xlu0 %2127 }
 0x5a7   : > { %v2145_v39 = vmul.f32 1.442695, %v2140_v33  ;;  %v2160_v41 = vmul.f32 1.442695, %v2155_v35  ;;  %v2136_v42 = vmax.f32 %v3734_v26, %v2125_v36  ;;  %v2137_v44 = vmax.f32 %v3751_v34, %v2128_v38 }
 0x5a9   : > { %3327 = vpow2.f32 %v2145_v39  ;;  %v2141_v46 = vsub.f32 %v3734_v26, %v2136_v42  ;;  %v2156_v47 = vsub.f32 %v3812_v1, %v2136_v42  ;;  %v2142_v48 = vsub.f32 %v3751_v34, %v2137_v44 }
 0x5aa   : > { %3329 = vpow2.f32 %v2160_v41  ;;  %v2157_v23 = vsub.f32 %v3814_v2, %v2137_v44  ;;  %v2131_v49 = vpop.xlane.xlu0 %2130  ;;  %v2134_v50 = vpop.xlane.xlu1 %2133 }
 0x5ab   : > { %v2147_v51 = vmul.f32 1.442695, %v2141_v46  ;;  %v2162_v53 = vmul.f32 1.442695, %v2156_v47  ;;  %v2149_v55 = vmul.f32 1.442695, %v2142_v48  ;;  %v2138_v57 = vmax.f32 %v3754_v37, %v2131_v49  ;;  %v3320_v2 = vpop.eup %3319 }
 0x5ac   : > { %3331 = vpow2.f32 %v1328_v45  ;;  %v2164_v59 = vmul.f32 1.442695, %v2157_v23  ;;  %v2139_v61 = vmax.f32 %v3757_v40, %v2134_v50  ;;  %v3322_v5 = vpop.eup %3321  ;;  %v1345_v9 = vmul.f32 0.0, %v3320_v2 }
 0x5ad   : > { %3333 = vpow2.f32 %v2147_v51  ;;  %v2143_v26 = vsub.f32 %v3754_v37, %v2138_v57  ;;  %v2158_v62 = vsub.f32 %v3820_v7, %v2138_v57  ;;  %v3324_v6 = vpop.eup %3323  ;;  %v1346_v11 = vmul.f32 0.0, %v3322_v5 }
 0x5ae   : > { %3335 = vpow2.f32 %v2162_v53  ;;  %v2144_v34 = vsub.f32 %v3757_v40, %v2139_v61  ;;  %v2159_v63 = vsub.f32 %v3822_v8, %v2139_v61  ;;  %v3326_v37 = vpop.eup %3325  ;;  %v1735_v7 = vadd.f32 %v3801_v52, %v1345_v9  ;;  %v1748_v52 = vld [vmem:[#allocation3 + $0x38] sm:$0xff]  ;;  %v1352_v39 = vpop.xlane.xlu0 %1351 }
 0x5af   : > { %3337 = vpow2.f32 %v2149_v55  ;;  %v2151_v0 = vmul.f32 1.442695, %v2143_v26  ;;  %v2166_v1 = vmul.f32 1.442695, %v2158_v62  ;;  %v1736_v15 = vadd.f32 %v3803_v54, %v1346_v11  ;;  %v1355_v41 = vpop.xlane.xlu1 %1354 }
 0x5b0   : > { %3339 = vpow2.f32 %v2164_v59  ;;  %v2153_v3 = vmul.f32 1.442695, %v2144_v34  ;;  %v2168_v4 = vmul.f32 1.442695, %v2159_v63  ;;  %v1347_v16 = vmul.f32 0.0, %v3324_v6 }
 0x5b1   : > { %3341 = vpow2.f32 %v2151_v0  ;;  %v1348_v20 = vmul.f32 0.0, %v3326_v37  ;;  %v1365_v47 = vadd.f32 %v1352_v39, %v1345_v9  ;;  %v1366_v23 = vadd.f32 %v1355_v41, %v1346_v11 }
 0x5b2   : > { %3343 = vpow2.f32 %v2166_v1  ;;  %v1737_v19 = vadd.f32 %v3805_v56, %v1347_v16  ;;  %v1358_v42 = vpop.xlane.xlu0 %1357 }
 0x5b3   : > { %3345 = vpow2.f32 %v2153_v3  ;;  %v1738_v27 = vadd.f32 %v3807_v58, %v1348_v20  ;;  %v1367_v53 = vadd.f32 %v1358_v42, %v1347_v16 }
 0x5b4   : > { %3347 = vpow2.f32 %v2168_v4 }
 0x5b6   : > { %v3328_v40 = vpop.eup %3327  ;;  %v1361_v45 = vpop.xlane.xlu0 %1360 }
 0x5b7   : > { %v3330_v8 = vpop.eup %3329  ;;  %v3859_v12 = vmul.f32 %v3328_v40, %v1735_v7  ;;  %v2170_v48 = vmul.f32 %v3328_v40, %v1365_v47  ;;  %v1368_v57 = vadd.f32 %v1361_v45, %v1348_v20 }
 0x5b8   : > { %3198 = vmatmul.mubr.msk.f32.vlgmr.msra.gmra.mxu1 %vm934_vm6, %v3330_v8  ;;  %v2175_v13 = vsel %vm934_vm6, %v3330_v8, 0.0 }
 0x5b9   : > { %v3332_v14 = vpop.eup %3331  ;;  %2176 = vadd.xlane.f32.xlu1 %v2175_v13  ;;  %3206 = vmatpush3.msra.mxu1 %v1747_v10 }
 0x5ba   : > { %v3334_v17 = vpop.eup %3333  ;;  %3207 = vmatprep.mubr.msk.f32.mxu1 %vm3456_vm5, %v3455_v43  ;;  %3215 = vmatprep.subr.mxu1 %v3455_v43  ;;  %v1349_v28 = vmul.f32 0.0, %v3332_v14  ;;  %v1364_v50 = vpop.xlane.xlu0 %1363 }
 0x5bb   : > { %v3336_v18 = vpop.eup %3335  ;;  %v3868_v21 = vmul.f32 %v3334_v17, %v1736_v15  ;;  %v2171_v55 = vmul.f32 %v3334_v17, %v1366_v23 }
 0x5bc   : > { %v3338_v22 = vpop.eup %3337  ;;  %3203 = vmatmul.mubr.msk.f32.vlgmr.msra.gmra.mxu0 %vm934_vm6, %v3336_v18  ;;  %v2178_v54 = vsel %vm934_vm6, %v3336_v18, 0.0  ;;  %v1739_v31 = vadd.f32 %v3809_v60, %v1349_v28  ;;  %v1369_v62 = vadd.f32 %v1364_v50, %v1349_v28  ;;  %v2775_v28 = vld [vmem:[%s3979_s4 + $0x18] sm:$0xff] }
 0x5bd   : > { %v3340_v25 = vpop.eup %3339  ;;  %2179 = vadd.xlane.f32.xlu1 %v2178_v54  ;;  %3211 = vmatpush3.msra.mxu0 %v1748_v52  ;;  %v3873_v29 = vmul.f32 %v3338_v22, %v1737_v19  ;;  %v2172_v61 = vmul.f32 %v3338_v22, %v1367_v53 }
 0x5be   : > { %v3342_v30 = vpop.eup %3341  ;;  %3208 = vmatmul.mubr.msk.f32.vlgmr.msra.gmra.mxu1 %vm934_vm6, %v3340_v25  ;;  %3212 = vmatprep.mubr.msk.f32.mxu0 %vm3456_vm5, %v3455_v43  ;;  %v2181_v35 = vsel %vm934_vm6, %v3340_v25, 0.0 }
 0x5bf   : > { %v3344_v56 = vpop.eup %3343  ;;  %3216 = vmatpush3.msra.mxu1 %v1749_v24  ;;  %3217 = vmatprep.mubr.msk.f32.mxu1 %vm3456_vm5, %v3455_v43  ;;  %v2198_v32 = vmul.f32 %v3342_v30, %v1738_v27  ;;  %v2173_v34 = vmul.f32 %v3342_v30, %v1368_v57  ;;  %v2776_v27 = vld [vmem:[%s3979_s4 + $0x20] sm:$0xff]  ;;  %v2773_v30 = vld [vmem:[%s3979_s4 + $0x8] sm:$0xff] }
 0x5c0   : > { %v3346_v58 = vpop.eup %3345  ;;  %3213 = vmatmul.mubr.msk.f32.vlgmr.msra.gmra.mxu0 %vm934_vm6, %v3344_v56  ;;  %v2184_v33 = vsel %vm934_vm6, %v3344_v56, 0.0  ;;  %3220 = vmatprep.subr.mxu0 %v3455_v43  ;;  %v2772_v56 = vld [vmem:[%s3979_s4] sm:$0xff] }
 0x5c1   : > { %v3348_v36 = vpop.eup %3347  ;;  %2185 = vadd.xlane.f32.xlu0 %v2184_v33  ;;  %2182 = vadd.xlane.f32.xlu1 %v2181_v35  ;;  %v2199_v38 = vmul.f32 %v3346_v58, %v1739_v31  ;;  %v2174_v2 = vmul.f32 %v3346_v58, %v1369_v62 }
 0x5c2   : > { %3218 = vmatmul.mubr.msk.f32.vlgmr.msra.gmra.mxu1 %vm934_vm6, %v3348_v36  ;;  %3230 = vmatprep.mubr.msk.f32.mxu0 %vm3456_vm5, %v3455_v43  ;;  %v2187_v60 = vsel %vm934_vm6, %v3348_v36, 0.0 }
 0x5c3   : > { %3221 = vmatpush3.msra.mxu0 %v2776_v27 }
 0x5c4   : > { %3222 = vmatprep.subr.mxu0 %v3455_v43 }
 0x5c5   : > { %2188 = vadd.xlane.f32.xlu1 %v2187_v60  ;;  %3223 = vmatpush3.msra.mxu0 %v2775_v28 }
 0x5c6   : > { %3224 = vmatprep.subr.mxu0 %v3455_v43 }
 0x642   : > { %v2177_v44 = vpop.xlane.xlu1 %2176 }
 0x643   : > { %v2190_v49 = vadd.f32 %v2177_v44, %v2170_v48 }
 0x645   : > { %3349 = vrcp.f32 %v2190_v49 }
 0x646   : > { %v2180_v46 = vpop.xlane.xlu1 %2179 }
 0x647   : > { %v2191_v59 = vadd.f32 %v2180_v46, %v2171_v55 }
 0x649   : > { %3351 = vrcp.f32 %v2191_v59 }
 0x64a   : > { %v2183_v51 = vpop.xlane.xlu1 %2182  ;;  %v2186_v26 = vpop.xlane.xlu0 %2185 }
 0x64b   : > { %v2192_v63 = vadd.f32 %v2183_v51, %v2172_v61  ;;  %v2193_v1 = vadd.f32 %v2186_v26, %v2173_v34 }
 0x64d   : > { %3353 = vrcp.f32 %v2192_v63 }
 0x64e   : > { %v2189_v0 = vpop.xlane.xlu1 %2188  ;;  %3355 = vrcp.f32 %v2193_v1 }
 0x64f   : > { %v2194_v3 = vadd.f32 %v2189_v0, %v2174_v2 }
 0x651   : > { %3357 = vrcp.f32 %v2194_v3 }
 0x652   : > { %v3350_v6 = vpop.eup %3349 }
 0x656   : > { %v3352_v10 = vpop.eup %3351 }
 0x65a   : > { %v3354_v15 = vpop.eup %3353 }
 0x678   : > { %v2269_v4 = vpop.f32.mrf.mxu1 }
 0x679   : > { %v2565_v5 = vadd.f32 %v2269_v4, %v3859_v12  ;;  %v3356_v12 = vpop.eup %3355 }
 0x67a   : > { %v3199_v9 = vpop.f32.mrf.mxu1 }
 0x67b   : > { %v2575_v37 = vmul.f32 %v3350_v6, %v2565_v5 }
 0x67c   : > { %v2342_v7 = vpop.f32.mrf.mxu0 }
 0x67d   : > { %v2566_v40 = vadd.f32 %v2342_v7, %v3868_v21  ;;  %2580 = vxpose.xlu0.b32.start.end [1/1] (short) (narrow) %v2575_v37, 8  ;;  %v3358_v21 = vpop.eup %3357 }
 0x67e   : > { %v2415_v8 = vpop.f32.mrf.mxu1  ;;  %v3204_v11 = vpop.f32.mrf.mxu0 }
 0x67f   : > { %v2576_v13 = vmul.f32 %v3352_v10, %v2566_v40  ;;  %v2567_v14 = vadd.f32 %v2415_v8, %v3873_v29  ;;  %v2774_v29 = vld [vmem:[%s3979_s4 + $0x10] sm:$0xff] }
 0x680   : > { %v3209_v16 = vpop.f32.mrf.mxu1  ;;  %v2488_v17 = vpop.f32.mrf.mxu0  ;;  %3225 = vmatpush3.msra.mxu0 %v2774_v29 }
 0x681   : > { %v2568_v52 = vadd.f32 %v2488_v17, %v2198_v32  ;;  %v2577_v18 = vmul.f32 %v3354_v15, %v2567_v14  ;;  %2612 = vxpose.xlu1.b32.start.end [1/1] (short) (narrow) %v2576_v13, 8  ;;  %3226 = vmatprep.subr.mxu0 %v3455_v43 }
 0x682   : > { %v2561_v19 = vpop.f32.mrf.mxu1  ;;  %v3214_v20 = vpop.f32.mrf.mxu0  ;;  %3227 = vmatpush3.msra.mxu0 %v2773_v30 }
 0x683   : > { %v2569_v22 = vadd.f32 %v2561_v19, %v2199_v38  ;;  %2644 = vxpose.xlu0.b32.start.end [1/1] (short) (narrow) %v2577_v18, 8  ;;  %v2578_v54 = vmul.f32 %v3356_v12, %v2568_v52  ;;  %3228 = vmatprep.subr.mxu0 %v3455_v43 }
 0x684   : > { %v3219_v24 = vpop.f32.mrf.mxu1  ;;  %3229 = vmatpush3.msra.mxu0 %v2772_v56 }
 0x685   : > { %v2579_v25 = vmul.f32 %v3358_v21, %v2569_v22 }
 0x687   : > { %2676 = vxpose.xlu0.b32.start.end [1/1] (short) (narrow) %v2578_v54, 8 }
 0x68b   : > { %2708 = vxpose.xlu0.b32.start.end [1/1] (short) (narrow) %v2579_v25, 8 }
 0x6f9   : > { %v2596_v31 = vpop.trf.xlu0 }
 0x6fa   : > { %2740 = vxpose.xlu1.b32.start [1/5] (short) (narrow) %v2596_v31, 8 }
 0x6fd   : > { %v2628_v32 = vpop.trf.xlu1 }
 0x6fe   : > { %2741 = vxpose.xlu1.b32.cont [2/5] (short) (narrow) %v2628_v32, 8 }
 0x6ff   : > { %v2660_v58 = vpop.trf.xlu0 }
 0x702   : > { %2742 = vxpose.xlu1.b32.cont [3/5] (short) (narrow) %v2660_v58, 8 }
 0x703   : > { %v2692_v33 = vpop.trf.xlu0 }
 0x706   : > { %2743 = vxpose.xlu1.b32.cont [4/5] (short) (narrow) %v2692_v33, 8 }
 0x707   : > { %v2724_v35 = vpop.trf.xlu0 }
 0x70a   : > { %2744 = vxpose.xlu1.b32.end [5/5] (short) (narrow) %v2724_v35, 8 }
 0x776   : > { %v2756_v36 = vpop.trf.xlu1 }
 0x777   : > { %3231 = vmatmul.mubr.msk.f32.vlgmr.msra.gmra.mxu0 %vm2777_vm7, %v2756_v36 }
 0x837   : > { %v2847_v43 = vpop.f32.mrf.mxu0 }
 0x838   : > { %2851 = vst.msk [vmem:[%s231_s27] sm:$0xff] %vm655_vm4, %v2847_v43 }
 0x839   : > { %v3232_v38 = vpop.f32.mrf.mxu0 }
 0x83a   : > { %3372 = shalt.err (!%p3369_p7)
}
 0x83b   : > { %s3373_s13 = scalar_lea.hbm %s3918_s16, 128  ;;  %s3377_s8 = scalar_lea.hbm %s3980_s5, 512 }
 0x83c   : > { %p3374_p9 = scmp.ne.s32.totalorder %s3918_s16, %s3373_s13  ;;  %p3378_p12 = scmp.lt.s32.totalorder %s3918_s16, %s3980_s5 }
 0x83d   : > { %p3379_p13 = scmp.lt.s32.totalorder %s3377_s8, %s3373_s13 }
 0x83e   : > { %p3375_p10 = pnand %p3374_p9, %p3540_p3 }
 0x83f   : > { %p3380_p0 = por %p3379_p13, %p3378_p12 }
 0x840   : > { %p3376_p11 = pneg %p3375_p10 }
 0x842   : > { %p3381_p1 = pnand %p3380_p0, %p3376_p11 }
 0x844   : > { %3384 = shalt.err (!%p3381_p1)
}
 0x845   : > { %3233 = dma.vmem_to_hbm [thread:$0]  (%p3540_p3), %s3920_s10, 128, %s3918_s16, %s2853_s21  }
 0x846 PF: > { %p3239_p2 = scmp.ge.s32.totalorder %s3451_s25, 2  ;;  %s2880_s15 = sand.u32 1, %s3423_s18  }
 0x847   : > { %s2881_s22 = scalar_lea.sflag [#allocation5], %s2880_s15 }
 0x848   : > { %p3236_p4 = pnand %p3239_p2, %p3549_p8 }
 0x84a   : > { %p3237_p5 = pneg %p3236_p4 }
 0x84c   : > { %3418 = dma.done.wait (%p3237_p5), %s2881_s22, 128  }
 0x84d   : > { %3420 = vsyncadd (%p3237_p5), %s2881_s22, 4294967168  ;;  %s18_s25 = sadd.s32 1, %s3451_s25   ;;  %s3983_s18 = smov %s3427_s19 }
 0x84e   : > { %p15_p6 = scmp.ge.s32.totalorder %s18_s25, 6   ;;  %s3984_s19 = smov %s3431_s20 }
 0x84f   : > { %s3985_s20 = smov %s3558_s11  ;;  %s3986_s21 = smov %s3443_s23 }
 0x850   : > { %s3987_s22 = smov %s3447_s24  ;;  %s3988_s23 = smov %s3991_s28 }
 0x851   : > { %s3989_s24 = smov %s3995_s29  ;;  %17 = sbr.rel (!%p15_p6) target bundleno = 5 (0x5), region = 80 }
 0x856   :  { %2886 = vsyncpa [#allocation5], 1 }
 0x857   :  { %2888 = vsyncpa [#allocation5 + $0x1], 1 }

</bundles_post_ra>
